<compile_context>
chip_gen: v5e
topology: v5e:2x2
jax: 0.10.0
libtpu: 0.0.40
codegen_flags: <defaults>
</compile_context>

<pallas_src>
import functools

import jax
import jax.numpy as jnp
from jax.experimental import pallas as pl
from jax.experimental.pallas import tpu as pltpu

# Raw (PyTorch) dims; hidden/output lane dims padded to 128 once, outside.
IN_RAW, HID_RAW, OUT_RAW = 784, 100, 10
HID_PAD, OUT_PAD = 128, 128


def mlp_kernel(x_ref, w1_ref, b1_ref, w2_ref, b2_ref, o_ref):
    # Hidden layer: (TM, 784)bf16 @ (784, 128)bf16 -> f32 accumulate on MXU.
    h = jnp.dot(x_ref[...], w1_ref[...], preferred_element_type=jnp.float32)
    h = jnp.maximum(h + b1_ref[...], 0.0)
    # Output layer: tiny relative to the first matmul; keep h in f32 (the
    # bf16->f32 upcast of w2 is a cheap VPU convert, kernel stays HBM-bound).
    out = jnp.dot(h, w2_ref[...].astype(jnp.float32),
                  preferred_element_type=jnp.float32)
    # Lane-dense 128-wide store (unmasked vst).
    o_ref[...] = (out + b2_ref[...]).astype(o_ref.dtype)


def _round_up(n, m):
    return ((n + m - 1) // m) * m


@functools.partial(jax.jit, static_argnames=("tm",))
def simple_net_forward(x, w1p, b1p, w2p, b2p, *, tm=1024):
    """Forward pass.  x: (B, 784); params come from pad_params() (bf16 weights)."""
    B = x.shape[0]
    # Stream x in bf16 (no-op if the caller already supplies bf16).
    x_bf = x.astype(jnp.bfloat16)

    # Batch tile: <= tm rows, multiple of 8 (sublanes).  For B <= tm, shrink
    # to ~B/2 so the "parallel" batch axis has >=2 tiles (v7x dual-TC).
    TM = min(tm, max(8, _round_up(pl.cdiv(B, 2), 8)))
    grid = (pl.cdiv(B, TM),)  # ragged last tile handled by Pallas

    flops = 2 * B * (IN_RAW * HID_PAD + HID_PAD * OUT_PAD)
    bytes_accessed = (
        2 * (x_bf.size + w1p.size + w2p.size)      # bf16 streams
        + 4 * (b1p.size + b2p.size + B * OUT_PAD)  # f32 biases + output
    )

    out_padded = pl.pallas_call(
        mlp_kernel,
        out_shape=jax.ShapeDtypeStruct((B, OUT_PAD), jnp.float32),
        grid_spec=pltpu.PrefetchScalarGridSpec(
            num_scalar_prefetch=0,
            grid=grid,
            in_specs=[
                pl.BlockSpec((TM, IN_RAW), lambda i: (i, 0)),        # x: streamed per tile
                pl.BlockSpec((IN_RAW, HID_PAD), lambda i: (0, 0)),   # w1: resident
                pl.BlockSpec((1, HID_PAD), lambda i: (0, 0)),        # b1: resident
                pl.BlockSpec((HID_PAD, OUT_PAD), lambda i: (0, 0)),  # w2: resident
                pl.BlockSpec((1, OUT_PAD), lambda i: (0, 0)),        # b2: resident
            ],
            out_specs=pl.BlockSpec((TM, OUT_PAD), lambda i: (i, 0)),
        ),
        compiler_params=pltpu.CompilerParams(
            dimension_semantics=("parallel",),          # shard batch tiles across TCs
            vmem_limit_bytes=32 * 1024 * 1024,          # headroom for larger tm
        ),
        cost_estimate=pl.CostEstimate(
            flops=flops, transcendentals=0, bytes_accessed=bytes_accessed
        ),
    )(x_bf, w1p, b1p, w2p, b2p)

    # Slice off the 10 -> 128 lane padding (no batch padding anymore).
    return out_padded[:, :OUT_RAW]


def init_params(key):
    # Mirror PyTorch nn.Linear default init (uniform in +/- 1/sqrt(fan_in)).
    k1, k2, k3, k4 = jax.random.split(key, 4)
    bound1 = 1.0 / jnp.sqrt(784.0)
    bound2 = 1.0 / jnp.sqrt(100.0)
    w1 = jax.random.uniform(k1, (IN_RAW, HID_RAW), jnp.float32, -bound1, bound1)
    b1 = jax.random.uniform(k2, (HID_RAW,), jnp.float32, -bound1, bound1)
    w2 = jax.random.uniform(k3, (HID_RAW, OUT_RAW), jnp.float32, -bound2, bound2)
    b2 = jax.random.uniform(k4, (OUT_RAW,), jnp.float32, -bound2, bound2)
    return w1, b1, w2, b2


def pad_params(w1, b1, w2, b2):
    # Zero-pad ONCE to 128-wide hidden/output lanes; store weights in bf16.
    # Zero padding keeps numerics exact:
    #  - padded hidden cols have w1=0, b1=0 -> ReLU(0)=0 -> killed by w2's
    #    zero-padded rows,
    #  - padded output cols (w2/b2 zero) are sliced off in the wrapper.
    w1p = jnp.pad(w1, ((0, 0), (0, HID_PAD - HID_RAW))).astype(jnp.bfloat16)
    b1p = jnp.pad(b1.reshape(1, -1), ((0, 0), (0, HID_PAD - HID_RAW)))  # f32
    w2p = jnp.pad(
        w2, ((0, HID_PAD - HID_RAW), (0, OUT_PAD - OUT_RAW))
    ).astype(jnp.bfloat16)
    b2p = jnp.pad(b2.reshape(1, -1), ((0, 0), (0, OUT_PAD - OUT_RAW)))  # f32
    return w1p, b1p, w2p, b2p


if __name__ == "__main__":
    key = jax.random.PRNGKey(0)
    k_params, k_x1, k_x2 = jax.random.split(key, 3)
    w1, b1, w2, b2 = init_params(k_params)
    w1p, b1p, w2p, b2p = pad_params(w1, b1, w2, b2)

    # Reference: f32 math on the SAME bf16-quantized x / weights the kernel
    # sees (only accumulation-order differences remain vs. the kernel).
    w1_q = w1.astype(jnp.bfloat16).astype(jnp.float32)
    w2_q = w2.astype(jnp.bfloat16).astype(jnp.float32)

    def ref_fwd(x):
        xq = x.astype(jnp.bfloat16).astype(jnp.float32)
        return jnp.maximum(xq @ w1_q + b1, 0.0) @ w2_q + b2

    # Small batch: TM shrinks to 8, single grid tile.
    x_small = jax.random.normal(k_x1, (8, 784), jnp.float32)
    out_small = jax.block_until_ready(
        simple_net_forward(x_small, w1p, b1p, w2p, b2p)
    )
    assert out_small.shape == (8, 10)
    assert jnp.allclose(out_small, ref_fwd(x_small), atol=5e-3, rtol=5e-3)

    # Non-multiple batch: TM=104, grid=(2,), ragged last tile (rows 200..207
    # are out-of-bounds reads whose results never reach the sliced output).
    x_med = jax.random.normal(k_x2, (200, 784), jnp.float32)
    out_med = jax.block_until_ready(
        simple_net_forward(x_med, w1p, b1p, w2p, b2p)
    )
    assert out_med.shape == (200, 10)
    assert jnp.allclose(out_med, ref_fwd(x_med), atol=5e-3, rtol=5e-3)

    print("KERNEL_OK")
</pallas_src>

<mosaic_0001>
module attributes {stable_mosaic.version = 11 : i64} {
  func.func @mlp_kernel(%arg0: i32, %arg1: memref<8x784xbf16, #tpu.memory_space<vmem>>, %arg2: memref<784x128xbf16, #tpu.memory_space<vmem>>, %arg3: memref<1x128xf32, #tpu.memory_space<vmem>>, %arg4: memref<128x128xbf16, #tpu.memory_space<vmem>>, %arg5: memref<1x128xf32, #tpu.memory_space<vmem>>, %arg6: memref<8x128xf32, #tpu.memory_space<vmem>>) attributes {dimension_semantics = [#tpu.dimension_semantics<parallel>], iteration_bounds = array<i64: 1>, scalar_prefetch = 0 : i64, scratch_operands = 0 : i64, tpu.core_type = #tpu.core_type<tc>, window_params = [{transform_indices = @transform_0, window_bounds = array<i64: 8, 784>}, {pipeline_mode = #tpu.pipeline_mode<synchronous>, transform_indices = @transform_1, window_bounds = array<i64: 784, 128>}, {pipeline_mode = #tpu.pipeline_mode<synchronous>, transform_indices = @transform_2, window_bounds = array<i64: 1, 128>}, {pipeline_mode = #tpu.pipeline_mode<synchronous>, transform_indices = @transform_3, window_bounds = array<i64: 128, 128>}, {pipeline_mode = #tpu.pipeline_mode<synchronous>, transform_indices = @transform_4, window_bounds = array<i64: 1, 128>}, {transform_indices = @transform_5, window_bounds = array<i64: 8, 128>}]} {
    %c0 = arith.constant 0 : index
    %c0_0 = arith.constant 0 : index
    %0 = vector.load %arg1[%c0, %c0_0] : memref<8x784xbf16, #tpu.memory_space<vmem>>, vector<8x784xbf16>
    %c0_1 = arith.constant 0 : index
    %c0_2 = arith.constant 0 : index
    %1 = vector.load %arg2[%c0_1, %c0_2] : memref<784x128xbf16, #tpu.memory_space<vmem>>, vector<784x128xbf16>
    %cst = arith.constant dense<0.000000e+00> : vector<8x128xf32>
    %2 = tpu.matmul %0, %1, %cst {dimension_numbers = #tpu.dot_dimension_numbers<[1], [0], [0], [1], [0, 0, 1, 1], [], []>} : vector<8x784xbf16>, vector<784x128xbf16>, vector<8x128xf32> -> vector<8x128xf32>
    %c0_3 = arith.constant 0 : index
    %c0_4 = arith.constant 0 : index
    %3 = vector.load %arg3[%c0_3, %c0_4] : memref<1x128xf32, #tpu.memory_space<vmem>>, vector<1x128xf32>
    %4 = vector.broadcast %3 : vector<1x128xf32> to vector<8x128xf32>
    %5 = arith.addf %2, %4 : vector<8x128xf32>
    %cst_5 = arith.constant 0.000000e+00 : f32
    %6 = vector.broadcast %cst_5 : f32 to vector<8x128xf32>
    %7 = arith.maximumf %5, %6 : vector<8x128xf32>
    %c0_6 = arith.constant 0 : index
    %c0_7 = arith.constant 0 : index
    %8 = vector.load %arg4[%c0_6, %c0_7] : memref<128x128xbf16, #tpu.memory_space<vmem>>, vector<128x128xbf16>
    %9 = arith.extf %8 : vector<128x128xbf16> to vector<128x128xf32>
    %cst_8 = arith.constant dense<0.000000e+00> : vector<8x128xf32>
    %10 = tpu.matmul %7, %9, %cst_8 {dimension_numbers = #tpu.dot_dimension_numbers<[1], [0], [0], [1], [0, 0, 1, 1], [], []>} : vector<8x128xf32>, vector<128x128xf32>, vector<8x128xf32> -> vector<8x128xf32>
    %c0_9 = arith.constant 0 : index
    %c0_10 = arith.constant 0 : index
    %11 = vector.load %arg5[%c0_9, %c0_10] : memref<1x128xf32, #tpu.memory_space<vmem>>, vector<1x128xf32>
    %12 = vector.broadcast %11 : vector<1x128xf32> to vector<8x128xf32>
    %13 = arith.addf %10, %12 : vector<8x128xf32>
    %c0_11 = arith.constant 0 : index
    %c0_12 = arith.constant 0 : index
    %14 = vector.load %arg6[%c0_11, %c0_12] : memref<8x128xf32, #tpu.memory_space<vmem>>, vector<8x128xf32>
    tpu.vector_store %arg6[%c0_11, %c0_12], %13 {strides = array<i32>} : memref<8x128xf32, #tpu.memory_space<vmem>>, vector<8x128xf32>,
    return
  }
  func.func @transform_0(%arg0: i32) -> (i32, i32) {
    %c0_i32 = arith.constant 0 : i32
    %c0_i32_0 = arith.constant 0 : i32
    return %arg0, %c0_i32 : i32, i32
  }
  func.func @transform_1(%arg0: i32) -> (i32, i32) {
    %c0_i32 = arith.constant 0 : i32
    %c0_i32_0 = arith.constant 0 : i32
    %c0_i32_1 = arith.constant 0 : i32
    return %c0_i32, %c0_i32_0 : i32, i32
  }
  func.func @transform_2(%arg0: i32) -> (i32, i32) {
    %c0_i32 = arith.constant 0 : i32
    %c0_i32_0 = arith.constant 0 : i32
    %c0_i32_1 = arith.constant 0 : i32
    return %c0_i32, %c0_i32_0 : i32, i32
  }
  func.func @transform_3(%arg0: i32) -> (i32, i32) {
    %c0_i32 = arith.constant 0 : i32
    %c0_i32_0 = arith.constant 0 : i32
    %c0_i32_1 = arith.constant 0 : i32
    return %c0_i32, %c0_i32_0 : i32, i32
  }
  func.func @transform_4(%arg0: i32) -> (i32, i32) {
    %c0_i32 = arith.constant 0 : i32
    %c0_i32_0 = arith.constant 0 : i32
    %c0_i32_1 = arith.constant 0 : i32
    return %c0_i32, %c0_i32_0 : i32, i32
  }
  func.func @transform_5(%arg0: i32) -> (i32, i32) {
    %c0_i32 = arith.constant 0 : i32
    %c0_i32_0 = arith.constant 0 : i32
    return %arg0, %c0_i32 : i32, i32
  }
}

</mosaic_0001>

<bundles_post_ra>
// kernel: simple_net_forward.1
= control target key start
LH: loop header
LB: loop body
LE: loop exit
PB: predicated region body
PF: predicated region fallthrough
CT: control target
= control target key end

     0   :  { %10 = vsyncpa [#allocation3], 0  ;;  %s1057_s0 = inlined_call_operand.vmem [shape: bf16[8,784], index: 0, kind: input, shape index: {}]   ;;  %s1058_s1 = inlined_call_operand.hbm [shape: bf16[784,128], index: 1, kind: input, shape index: {}]   ;;  %s1059_s2 = inlined_call_operand.vmem [shape: f32[1,128], index: 2, kind: input, shape index: {}]   ;;  %s1060_s3 = inlined_call_operand.vmem [shape: bf16[128,128], index: 3, kind: input, shape index: {}]   ;;  %s1061_s4 = inlined_call_operand.vmem [shape: f32[1,128], index: 4, kind: input, shape index: {}]   ;;  %s1062_s5 = inlined_call_operand.hbm [shape: f32[8,128], index: 5, kind: output, shape index: {}]  }
   0x1   :  { %11 = vsyncpa [#allocation4], 0  ;;  %s18_s20 = sshll.u32 %s1058_s1, 4  ;;  %s975_s21 = smov [#allocation2]   ;;  %s19_s20 = int_to_ptr.hbm [resolvable:$true] %s18_s20 }
   0x2   :  { %s20_s22 = sshll.u32 %s975_s21, 4  ;;  %s976_s23 = smov 64   ;;  %s21_s22 = int_to_ptr.vmem [resolvable:$true] %s20_s22 }
   0x3   :  { %s977_s24 = smov 4  }
   0x4   :  { %26 = dma.hbm_to_vmem [thread:$0]  %s19_s20, 6272, %s21_s22, [#allocation3], %s976_s23, %s976_s23, %s977_s24  }
   0x5   :  { %971 = dma.done.wait [#allocation3], 6272  }
   0x6   :  { %972 = vsyncadd [#allocation3], 4294961024  ;;  %v836_v0 = vld [vmem:[#allocation2 + $0x38] sm:$0xff]  ;;  %v835_v3 = vld [vmem:[#allocation2 + $0x30] sm:$0xff]  ;;  %vm462_vm0 = vcmask 130048   ;;  %s622_s27 = sshll.u32 %s1062_s5, 4  ;;  %s623_s27 = int_to_ptr.hbm [resolvable:$true] %s622_s27 }
   0x7   :  { %v844_v1 = vld [vmem:[#allocation2 + $0x78] sm:$0xff]  ;;  %466 = vmatpush.bf16.msra.mxu0 %v836_v0  ;;  %v843_v4 = vld [vmem:[#allocation2 + $0x70] sm:$0xff]  ;;  %v834_v8 = vld [vmem:[#allocation2 + $0x28] sm:$0xff] }
   0x8   :  { %v852_v2 = vld [vmem:[#allocation2 + $0xb8] sm:$0xff]  ;;  %479 = vmatpush.bf16.msra.mxu1 %v844_v1  ;;  %v851_v5 = vld [vmem:[#allocation2 + $0xb0] sm:$0xff]  ;;  %v842_v9 = vld [vmem:[#allocation2 + $0x68] sm:$0xff] }
   0x9   :  { %492 = vmatpush.bf16.msra.mxu2 %v852_v2  ;;  %v860_v6 = vld [vmem:[#allocation2 + $0xf8] sm:$0xff]  ;;  %v859_v7 = vld [vmem:[#allocation2 + $0xf0] sm:$0xff]  ;;  %v850_v10 = vld [vmem:[#allocation2 + $0xa8] sm:$0xff] }
   0xa   :  { %505 = vmatpush.bf16.msra.mxu3 %v860_v6  ;;  %v858_v11 = vld [vmem:[#allocation2 + $0xe8] sm:$0xff]  ;;  %v833_v12 = vld [vmem:[#allocation2 + $0x20] sm:$0xff]  ;;  %v832_v16 = vld [vmem:[#allocation2 + $0x18] sm:$0xff] }
   0xb   :  { %467 = vmatpush.bf16.msra.mxu0 %v835_v3  ;;  %v841_v13 = vld [vmem:[#allocation2 + $0x60] sm:$0xff]  ;;  %v840_v17 = vld [vmem:[#allocation2 + $0x58] sm:$0xff]  ;;  %v831_v20 = vld [vmem:[#allocation2 + $0x10] sm:$0xff] }
   0xc   :  { %480 = vmatpush.bf16.msra.mxu1 %v843_v4  ;;  %v849_v14 = vld [vmem:[#allocation2 + $0xa0] sm:$0xff]  ;;  %v848_v18 = vld [vmem:[#allocation2 + $0x98] sm:$0xff]  ;;  %v839_v21 = vld [vmem:[#allocation2 + $0x50] sm:$0xff] }
   0xd   :  { %493 = vmatpush.bf16.msra.mxu2 %v851_v5  ;;  %v857_v15 = vld [vmem:[#allocation2 + $0xe0] sm:$0xff]  ;;  %v856_v19 = vld [vmem:[#allocation2 + $0xd8] sm:$0xff]  ;;  %v847_v22 = vld [vmem:[#allocation2 + $0x90] sm:$0xff] }
   0xe   :  { %506 = vmatpush.bf16.msra.mxu3 %v859_v7  ;;  %v855_v23 = vld [vmem:[#allocation2 + $0xd0] sm:$0xff]  ;;  %v830_v24 = vld [vmem:[#allocation2 + $0x8] sm:$0xff]  ;;  %v38_v26 = vld [vmem:[%s1057_s0] sm:$0xff] }
   0xf   :  { %468 = vmatpush.bf16.msra.mxu0 %v834_v8  ;;  %v838_v25 = vld [vmem:[#allocation2 + $0x48] sm:$0xff]  ;;  %v148_v29 = vunpack.c.l.b16 %v38_v26  ;;  %v149_v31 = vunpack.c.h.b16 %v38_v26  ;;  %v829_v32 = vld [vmem:[#allocation2] sm:$0xff]  ;;  %v868_v34 = vld [vmem:[#allocation2 + $0x138] sm:$0xff] }
  0x10   :  { %481 = vmatpush.bf16.msra.mxu1 %v842_v9  ;;  %v846_v27 = vld [vmem:[#allocation2 + $0x88] sm:$0xff]  ;;  %v837_v33 = vld [vmem:[#allocation2 + $0x40] sm:$0xff]  ;;  %v876_v35 = vld [vmem:[#allocation2 + $0x178] sm:$0xff] }
  0x11   :  { %494 = vmatpush.bf16.msra.mxu2 %v850_v10  ;;  %v39_v28 = vld [vmem:[%s1057_s0 + $0x8] sm:$0xff]  ;;  %v845_v36 = vld [vmem:[#allocation2 + $0x80] sm:$0xff]  ;;  %v155_v38 = vpack.c.b16 %v148_v29, %v148_v29  ;;  %v156_v39 = vpack.c.b16 %v149_v31, %v149_v31  ;;  %v867_v43 = vld [vmem:[#allocation2 + $0x130] sm:$0xff] }
  0x12   :  { %507 = vmatpush.bf16.msra.mxu3 %v858_v11  ;;  %v854_v30 = vld [vmem:[#allocation2 + $0xc8] sm:$0xff]  ;;  %v150_v37 = vunpack.c.l.b16 %v39_v28  ;;  %v151_v40 = vunpack.c.h.b16 %v39_v28  ;;  %v853_v41 = vld [vmem:[#allocation2 + $0xc0] sm:$0xff]  ;;  %v875_v44 = vld [vmem:[#allocation2 + $0x170] sm:$0xff] }
  0x13   :  { %469 = vmatpush.bf16.msra.mxu0 %v833_v12  ;;  %v877_v42 = vld [vmem:[#allocation2 + $0x180] sm:$0xff]  ;;  %v866_v47 = vld [vmem:[#allocation2 + $0x128] sm:$0xff]  ;;  %v41_v51 = vld [vmem:[%s1057_s0 + $0x18] sm:$0xf] }
  0x14   :  { %482 = vmatpush.bf16.msra.mxu1 %v841_v13  ;;  %v157_v45 = vpack.c.b16 %v150_v37, %v150_v37  ;;  %v158_v46 = vpack.c.b16 %v151_v40, %v151_v40  ;;  %v874_v48 = vld [vmem:[#allocation2 + $0x168] sm:$0xff]  ;;  %v865_v49 = vld [vmem:[#allocation2 + $0x120] sm:$0xff]  ;;  %v864_v52 = vld [vmem:[#allocation2 + $0x118] sm:$0xff]  ;;  %v154_v54 = vunpack.c.l.b16 %v41_v51 }
  0x15   :  { %495 = vmatpush.bf16.msra.mxu2 %v849_v14  ;;  %v873_v50 = vld [vmem:[#allocation2 + $0x160] sm:$0xff]  ;;  %v872_v53 = vld [vmem:[#allocation2 + $0x158] sm:$0xff]  ;;  %v863_v55 = vld [vmem:[#allocation2 + $0x110] sm:$0xff] }
  0x16   :  { %508 = vmatpush.bf16.msra.mxu3 %v857_v15  ;;  %v871_v56 = vld [vmem:[#allocation2 + $0x150] sm:$0xff]  ;;  %v161_v57 = vpack.c.b16 %v154_v54, %v154_v54  ;;  %v862_v58 = vld [vmem:[#allocation2 + $0x108] sm:$0xff]  ;;  %v861_v63 = vld [vmem:[#allocation2 + $0x100] sm:$0xff] }
  0x17   :  { %470 = vmatpush.bf16.msra.mxu0 %v832_v16  ;;  %v870_v59 = vld [vmem:[#allocation2 + $0x148] sm:$0xff]  ;;  %v40_v60 = vld [vmem:[%s1057_s0 + $0x10] sm:$0xff]  ;;  %v869_v0 = vld [vmem:[#allocation2 + $0x140] sm:$0xff] }
  0x18   :  { %483 = vmatpush.bf16.msra.mxu1 %v840_v17  ;;  %v152_v61 = vunpack.c.l.b16 %v40_v60  ;;  %v153_v62 = vunpack.c.h.b16 %v40_v60  ;;  %v916_v3 = vld [vmem:[%s1060_s3 + $0x38] sm:$0xff]   ;;  %v915_v6 = vld [vmem:[%s1060_s3 + $0x30] sm:$0xff]   ;;  %v914_v9 = vld [vmem:[%s1060_s3 + $0x28] sm:$0xff]  }
  0x19   :  { %496 = vmatpush.bf16.msra.mxu2 %v848_v18  ;;  %v909_v4 = vunpack.c.h.bf16 %v916_v3  ;;  %v908_v5 = vunpack.c.l.bf16 %v916_v3  ;;  %v905_v7 = vunpack.c.h.bf16 %v915_v6  ;;  %v904_v8 = vunpack.c.l.bf16 %v915_v6  ;;  %v913_v12 = vld [vmem:[%s1060_s3 + $0x20] sm:$0xff]   ;;  %v912_v15 = vld [vmem:[%s1060_s3 + $0x18] sm:$0xff]   ;;  %v911_v18 = vld [vmem:[%s1060_s3 + $0x10] sm:$0xff]  }
  0x1a   :  { %509 = vmatpush.bf16.msra.mxu3 %v856_v19  ;;  %v159_v1 = vpack.c.b16 %v152_v61, %v152_v61  ;;  %v160_v2 = vpack.c.b16 %v153_v62, %v153_v62  ;;  %v901_v10 = vunpack.c.h.bf16 %v914_v9  ;;  %v900_v11 = vunpack.c.l.bf16 %v914_v9  ;;  %v879_v26 = vld [vmem:[%s1060_s3] sm:$0xff]  }
  0x1b   :  { %471 = vmatpush.bf16.msra.mxu0 %v831_v20  ;;  %v897_v13 = vunpack.c.h.bf16 %v913_v12  ;;  %v896_v14 = vunpack.c.l.bf16 %v913_v12  ;;  %v893_v16 = vunpack.c.h.bf16 %v912_v15  ;;  %v892_v17 = vunpack.c.l.bf16 %v912_v15 }
  0x1c   :  { %484 = vmatpush.bf16.msra.mxu1 %v839_v21  ;;  %v889_v19 = vunpack.c.h.bf16 %v911_v18  ;;  %v888_v20 = vunpack.c.l.bf16 %v911_v18  ;;  %v910_v21 = vld [vmem:[%s1060_s3 + $0x8] sm:$0xff]   ;;  %v880_v28 = vunpack.c.l.bf16 %v879_v26 }
  0x1d   :  { %497 = vmatpush.bf16.msra.mxu2 %v847_v22  ;;  %v885_v22 = vunpack.c.h.bf16 %v910_v21 }
  0x1e   :  { %510 = vmatpush.bf16.msra.mxu3 %v855_v23  ;;  %v884_v23 = vunpack.c.l.bf16 %v910_v21 }
  0x1f   :  { %472 = vmatpush.bf16.msra.mxu0 %v830_v24 }
  0x20   :  { %485 = vmatpush.bf16.msra.mxu1 %v838_v25 }
  0x21   :  { %498 = vmatpush.bf16.msra.mxu2 %v846_v27  ;;  %v881_v27 = vunpack.c.h.bf16 %v879_v26 }
  0x22   :  { %511 = vmatpush.bf16.msra.mxu3 %v854_v30 }
  0x23   :  { %473 = vmatpush.bf16.msra.mxu0 %v829_v32 }
  0x24   :  { %486 = vmatpush.bf16.msra.mxu1 %v837_v33  ;;  %v921_v33 = vld [vmem:[%s1059_s2] ss:$0 sm:$0xff]  ;;  %s978_s2 = smov [#allocation5]  }
  0x25   :  { %499 = vmatpush.bf16.msra.mxu2 %v845_v36  ;;  %s620_s1 = sshll.u32 %s978_s2, 4  ;;  %s621_s1 = int_to_ptr.vmem [resolvable:$true] %s620_s1 }
  0x26   :  { %474 = vmatmul.bf16.vlgmr.msra.gmra.mxu0 %v155_v38  ;;  %512 = vmatpush.bf16.msra.mxu3 %v853_v41 }
  0x27   :  { %518 = vmatpush.bf16.msrb.mxu0 %v868_v34  ;;  %487 = vmatmul.bf16.vlgmr.msra.gmra.mxu1 %v156_v39 }
  0x28   :  { %531 = vmatpush.bf16.msrb.mxu1 %v876_v35  ;;  %500 = vmatmul.bf16.vlgmr.msra.gmra.mxu2 %v157_v45 }
  0x29   :  { %551 = vmatpush.bf16.msrb.mxu2 %v877_v42  ;;  %513 = vmatmul.bf16.vlgmr.msra.gmra.mxu3 %v158_v46 }
  0x2a   :  { %594 = vmatpush.msrb.mxu3 %v909_v4 }
  0x2b   :  { %519 = vmatpush.bf16.msrb.mxu0 %v867_v43 }
  0x2c   :  { %532 = vmatpush.bf16.msrb.mxu1 %v875_v44  ;;  %595 = vmatpush.msrb.mxu3 %v908_v5 }
  0x2e   :  { %596 = vmatpush.msrb.mxu3 %v905_v7 }
  0x2f   :  { %520 = vmatpush.bf16.msrb.mxu0 %v866_v47 }
  0x30   :  { %533 = vmatpush.bf16.msrb.mxu1 %v874_v48  ;;  %597 = vmatpush.msrb.mxu3 %v904_v8 }
  0x32   :  { %598 = vmatpush.msrb.mxu3 %v901_v10 }
  0x33   :  { %521 = vmatpush.bf16.msrb.mxu0 %v865_v49 }
  0x34   :  { %534 = vmatpush.bf16.msrb.mxu1 %v873_v50  ;;  %599 = vmatpush.msrb.mxu3 %v900_v11  ;;  %v922_v50 = vld [vmem:[%s1061_s4] ss:$0 sm:$0xff] }
  0x36   :  { %600 = vmatpush.msrb.mxu3 %v897_v13 }
  0x37   :  { %522 = vmatpush.bf16.msrb.mxu0 %v864_v52 }
  0x38   :  { %535 = vmatpush.bf16.msrb.mxu1 %v872_v53  ;;  %828 = vmatmul.msk.bf16.vlgmr.msrb.gmra.mxu2 %vm462_vm0, %v161_v57 }
  0x39   :  { %601 = vmatpush.msrb.mxu3 %v896_v14 }
  0x3b   :  { %523 = vmatpush.bf16.msrb.mxu0 %v863_v55  ;;  %602 = vmatpush.msrb.mxu3 %v893_v16 }
  0x3c   :  { %536 = vmatpush.bf16.msrb.mxu1 %v871_v56 }
  0x3d   :  { %603 = vmatpush.msrb.mxu3 %v892_v17 }
  0x3f   :  { %524 = vmatpush.bf16.msrb.mxu0 %v862_v58  ;;  %604 = vmatpush.msrb.mxu3 %v889_v19 }
  0x40   :  { %537 = vmatpush.bf16.msrb.mxu1 %v870_v59 }
  0x41   :  { %605 = vmatpush.msrb.mxu3 %v888_v20 }
  0x43   :  { %525 = vmatpush.bf16.msrb.mxu0 %v861_v63  ;;  %606 = vmatpush.msrb.mxu3 %v885_v22 }
  0x44   :  { %538 = vmatpush.bf16.msrb.mxu1 %v869_v0 }
  0x45   :  { %607 = vmatpush.msrb.mxu3 %v884_v23 }
  0x46   :  { %526 = vmatmul.bf16.vlgmr.msrb.gmra.mxu0 %v159_v1 }
  0x47   :  { %539 = vmatmul.bf16.vlgmr.msrb.gmra.mxu1 %v160_v2  ;;  %608 = vmatpush.msrb.mxu3 %v881_v27 }
  0x49   :  { %609 = vmatpush.msrb.mxu3 %v880_v28 }
  0xa3   :  { %v475_v24 = vpop.f32.mrf.mxu0 }
  0xa4   :  { %v488_v25 = vpop.f32.mrf.mxu1  ;;  %v476_v34 = vadd.f32 %v921_v33, %v475_v24 }
  0xa6   :  { %v489_v37 = vadd.f32 %v488_v25, %v476_v34 }
  0xab   :  { %v477_v29 = vpop.f32.mrf.mxu0  ;;  %v501_v31 = vpop.f32.mrf.mxu2 }
  0xac   :  { %v490_v30 = vpop.f32.mrf.mxu1  ;;  %v514_v32 = vpop.f32.mrf.mxu3  ;;  %v502_v38 = vadd.f32 %v501_v31, %v489_v37 }
  0xae   :  { %v515_v40 = vadd.f32 %v514_v32, %v502_v38 }
  0xb3   :  { %v503_v35 = vpop.f32.mrf.mxu2 }
  0xb4   :  { %v516_v36 = vpop.f32.mrf.mxu3 }
  0xbb   :  { %v553_v39 = vpop.f32.mrf.mxu2 }
  0xc3   :  { %v527_v41 = vpop.f32.mrf.mxu0  ;;  %v555_v45 = vpop.f32.mrf.mxu2 }
  0xc4   :  { %v540_v42 = vpop.f32.mrf.mxu1  ;;  %v528_v43 = vadd.f32 %v527_v41, %v515_v40 }
  0xc6   :  { %v541_v44 = vadd.f32 %v540_v42, %v528_v43 }
  0xc8   :  { %v554_v46 = vadd.f32 %v553_v39, %v541_v44 }
  0xca   :  { %v557_v47 = vmax.f32 %v554_v46, 0.0 }
  0xcb   :  { %v529_v48 = vpop.f32.mrf.mxu0 }
  0xcc   :  { %v542_v49 = vpop.f32.mrf.mxu1  ;;  %610 = vmatmul.f32.vlgmr.msrb.gmra.mxu3 %v557_v47 }
 0x14f   :  { %v611_v51 = vpop.f32.mrf.mxu3 }
 0x150   :  { %v612_v52 = vadd.f32 %v922_v50, %v611_v51 }
 0x152   :  { %614 = vst [vmem:[#allocation5] sm:$0xff] %v612_v52 }
 0x153   :  { %625 = dma.vmem_to_hbm [thread:$0]  %s621_s1, 128, %s623_s27, [#allocation4]  }
 0x154   :  { %973 = dma.done.wait [#allocation4], 128  }
 0x155   :  { %974 = vsyncadd [#allocation4], 4294967168 }
 0x156   :  { %630 = vsyncpa [#allocation3], 1 }
 0x157   :  { %631 = vsyncpa [#allocation4], 1 }

</bundles_post_ra>
